<compile_context>
chip_gen: v5e
topology: v5e:2x2
jax: 0.10.0
libtpu: 0.0.40
codegen_flags: <defaults>
</compile_context>

<pallas_src>
import functools
import math

import numpy as np
import jax
import jax.numpy as jnp
from jax.experimental import pallas as pl
from jax.experimental.pallas import tpu as pltpu


# ----------------------------------------------------------------------------
# Host-side setup: YaRN theta table (mirrors YaRNEmbeddings._calculate_thetas
# for select_mask=None).
# ----------------------------------------------------------------------------
def yarn_thetas(dim, effective_dim, seq_len, context_len, base, alpha, beta,
                total_seq_len, offset=0, length_scale=None):
    half = effective_dim // 2
    freqs = base ** (-2.0 * np.arange(1, half + 1, dtype=np.float64) / dim)
    thetas = np.repeat(freqs, 2)                               # (eff,), pairs share a freq

    # ramp( context_len / (2*pi / theta) )
    ratio = context_len * thetas / (2.0 * math.pi)
    ramp = np.zeros_like(ratio)
    interp = (ratio >= alpha) & (ratio <= beta)
    ramp[interp] = (ratio[interp] - alpha) / (beta - alpha)
    ramp[ratio > beta] = 1.0

    scale = max(1.0, total_seq_len / context_len)
    ls = 0.1 * math.log(scale) + 1.0 if length_scale is None else length_scale

    thetas = ((1.0 - ramp) * thetas / scale + ramp * thetas) * ls   # (eff,)
    pos = np.arange(1 + offset, seq_len + 1 + offset, dtype=np.float64)
    full = pos[:, None] * thetas[None, :]                      # (seq_len, eff)
    return full.astype(np.float32)


# ----------------------------------------------------------------------------
# Host-side setup: per-head cos / parity-masked, sign-folded sin tables in the
# NATURAL interleaved layout, shape (3, seq_len, dim).
#   cs[0] = cos(theta)  on rotary dims, 1 on pass dims
#   cs[1] = coefficient multiplying the lane+1 neighbour (-sin on even rotary dims)
#   cs[2] = coefficient multiplying the lane-1 neighbour (+sin on odd rotary dims)
# ----------------------------------------------------------------------------
def build_tables(dim, effective_dim, thetas_eff, roll_is_numpy_convention=True):
    S = thetas_eff.shape[0]
    cos_t = np.ones((S, dim), dtype=np.float32)
    c_hi = np.zeros((S, dim), dtype=np.float32)
    c_lo = np.zeros((S, dim), dtype=np.float32)
    cos_t[:, :effective_dim] = np.cos(thetas_eff).astype(np.float32)
    s = np.sin(thetas_eff).astype(np.float32)
    c_hi[:, 0:effective_dim:2] = -s[:, 0::2]     # even p: out += -sin * x[p+1]
    c_lo[:, 1:effective_dim:2] = s[:, 1::2]      # odd  p: out += +sin * x[p-1]
    if roll_is_numpy_convention:
        return np.stack([cos_t, c_hi, c_lo], axis=0)
    # Flipped roll convention: the kernel's two rolls swap neighbours, so swap tables.
    return np.stack([cos_t, c_lo, c_hi], axis=0)


# ----------------------------------------------------------------------------
# One-time probe: determine pltpu.roll's shift convention (so the sin tables
# can be ordered correctly regardless of the lowering's rotation direction).
# ----------------------------------------------------------------------------
def _roll_probe_kernel(x_ref, o_ref):
    o_ref[...] = pltpu.roll(x_ref[...], shift=1, axis=1)


def roll_matches_numpy():
    x = jnp.broadcast_to(jnp.arange(128, dtype=jnp.float32)[None, :], (8, 128))
    out = pl.pallas_call(
        _roll_probe_kernel,
        out_shape=jax.ShapeDtypeStruct((8, 128), jnp.float32),
    )(x)
    # jnp.roll convention: roll(x, 1)[0] == x[-1] == 127
    return int(jax.block_until_ready(out)[0, 0]) == 127


# ----------------------------------------------------------------------------
# Pallas kernel: out = cos * x + c_hi * x[lane+1] + c_lo * x[lane-1]
# Pure VPU/XLU FMA on a lane-dense (s_tile, H*D) tile; no MXU, no transcendentals.
# ----------------------------------------------------------------------------
def yarn_kernel(cs_ref, x_ref, o_ref):
    x = x_ref[...].astype(jnp.float32)               # (s_tile, L), L = H*D
    L = x.shape[-1]
    D = cs_ref.shape[-1]
    nh = L // D

    def expand(t):                                    # (s_tile, D) -> (s_tile, L), heads share tables
        return t if nh == 1 else jnp.concatenate([t] * nh, axis=-1)

    cos = expand(cs_ref[0])
    c_hi = expand(cs_ref[1])                          # multiplies the lane+1 neighbour
    c_lo = expand(cs_ref[2])                          # multiplies the lane-1 neighbour

    x_hi = pltpu.roll(x, shift=L - 1, axis=1)         # x_hi[p] = x[(p+1) % L]
    x_lo = pltpu.roll(x, shift=1, axis=1)             # x_lo[p] = x[(p-1) % L]
    # Wrap-around lanes contribute nothing: the masked sin coefficient is 0 there.
    o_ref[...] = (cos * x + c_hi * x_hi + c_lo * x_lo).astype(o_ref.dtype)


# ----------------------------------------------------------------------------
# Wrapper
# ----------------------------------------------------------------------------
def _pick_s_tile(S, L, D, itemsize, budget_bytes=16 * 1024 * 1024, max_rows=2048):
    # steady-state pipeline VMEM ≈ 2 buffers x (x_in + x_out) + 2 buffers x 3 tables
    per_row = 2 * (2 * L * itemsize) + 2 * (3 * D * 4)
    t = (budget_bytes // per_row) // 8 * 8
    t = max(8, min(int(t), max_rows))
    return S if t >= S else t


@functools.partial(jax.jit, static_argnames=("s_tile",))
def yarn_apply(x, cs, s_tile=None):
    """x: (B, H, S, D); cs: (3, S_table, D) float32 tables with S_table >= S."""
    B, H, S, D = x.shape
    L = H * D
    cs = cs[:, :S, :]                                  # module slices thetas to x.size(2)

    # Layout plumbing (plain XLA, outside the kernel): (B,H,S,D) -> lane-dense (B,S,H*D).
    # TODO(synk): if the producer of x can emit (B,S,H,D) directly, this transpose and
    # the inverse one below disappear (two fewer full HBM passes).
    xt = jnp.transpose(x, (0, 2, 1, 3)).reshape(B, S, L)

    if s_tile is None:
        s_tile = _pick_s_tile(S, L, D, jnp.dtype(x.dtype).itemsize)
    grid = (pl.cdiv(S, s_tile), B)                     # batch innermost -> tables stay VMEM-resident

    out = pl.pallas_call(
        yarn_kernel,
        out_shape=jax.ShapeDtypeStruct((B, S, L), x.dtype),
        grid=grid,
        in_specs=[
            pl.BlockSpec((3, s_tile, D), lambda s, b: (0, s, 0)),     # constant over b -> no re-DMA
            pl.BlockSpec((None, s_tile, L), lambda s, b: (b, s, 0)),  # lane-dense x tile
        ],
        out_specs=pl.BlockSpec((None, s_tile, L), lambda s, b: (b, s, 0)),
        input_output_aliases={1: 0},                   # out reuses x's HBM buffer
        compiler_params=pltpu.CompilerParams(
            dimension_semantics=("parallel", "parallel"),
            vmem_limit_bytes=32 * 1024 * 1024),
        cost_estimate=pl.CostEstimate(
            flops=5 * B * S * L,
            transcendentals=0,
            bytes_accessed=2 * B * S * L * jnp.dtype(x.dtype).itemsize + 3 * S * D * 4),
    )(cs, xt)

    return jnp.transpose(out.reshape(B, S, H, D), (0, 2, 1, 3))


# ----------------------------------------------------------------------------
# Pure-numpy reference (mirrors YaRNEmbeddings.forward, select_mask=None).
# TODO(synk): the select_mask (Mixture-of-Depths) path and the module's stateful
# `last_offset` caching are host-side control flow and are not implemented here.
# ----------------------------------------------------------------------------
def reference(x, thetas_eff, effective_dim):
    x = np.asarray(x)
    S = x.shape[2]
    th = thetas_eff[:S]                                # (S, eff)
    x_pos = x[..., :effective_dim]
    x_pass = x[..., effective_dim:]
    x1 = x_pos[..., 0::2]
    x2 = x_pos[..., 1::2]
    rot = np.stack([-x2, x1], axis=-1).reshape(x_pos.shape)
    out_pos = np.cos(th)[None, None] * x_pos + np.sin(th)[None, None] * rot
    return np.concatenate([out_pos, x_pass], axis=-1)


if __name__ == "__main__":
    # Module hyper-params.
    dim = 32
    dim_embedding_pct = 0.5
    effective_dim = int(dim * dim_embedding_pct)   # 16
    seq_len = 16
    context_len = 8
    context_len_ext = 16                           # stored by the module, unused in forward
    base = 10000
    alpha, beta = 1, 32
    length_scale = None

    # Forward-call args.
    B, H = 2, 4
    total_seq_len = 16                             # scale = 2.0
    offset = 0

    key = jax.random.PRNGKey(0)
    k1, k2 = jax.random.split(key)

    # Host-side setup: theta table + packed per-head cos/sin tables.
    thetas_eff = yarn_thetas(dim, effective_dim, seq_len, context_len, base,
                             alpha, beta, total_seq_len, offset, length_scale)
    cs = jnp.asarray(build_tables(dim, effective_dim, thetas_eff,
                                  roll_is_numpy_convention=roll_matches_numpy()))

    # --- test 1: full sequence (S == seq_len), single exact tile -------------
    x = jax.random.normal(k1, (B, H, seq_len, dim), dtype=jnp.float32)
    out = jax.block_until_ready(yarn_apply(x, cs))
    ref = reference(np.asarray(x), thetas_eff[:seq_len], effective_dim)
    np.testing.assert_allclose(np.asarray(out), ref, rtol=1e-5, atol=1e-5)

    # --- test 2: shorter sequence with a forced partial tail tile ------------
    S2 = 12
    x2 = jax.random.normal(k2, (B, H, S2, dim), dtype=jnp.float32)
    out2 = jax.block_until_ready(yarn_apply(x2, cs, s_tile=8))
    ref2 = reference(np.asarray(x2), thetas_eff[:S2], effective_dim)
    np.testing.assert_allclose(np.asarray(out2), ref2, rtol=1e-5, atol=1e-5)

    print("KERNEL_OK")
</pallas_src>

<mosaic_0001>
module attributes {stable_mosaic.version = 11 : i64} {
  func.func @_roll_probe_kernel(%arg0: memref<8x128xf32, #tpu.memory_space<vmem>>, %arg1: memref<8x128xf32, #tpu.memory_space<vmem>>) attributes {dimension_semantics = [], scalar_prefetch = 0 : i64, scratch_operands = 0 : i64, tpu.core_type = #tpu.core_type<tc>} {
    %c0 = arith.constant 0 : index
    %c0_0 = arith.constant 0 : index
    %0 = vector.load %arg0[%c0, %c0_0] : memref<8x128xf32, #tpu.memory_space<vmem>>, vector<8x128xf32>
    %c1_i32 = arith.constant 1 : i32
    %1 = tpu.dynamic_rotate %0 by %c1_i32 dim 1 : vector<8x128xf32>, i32 -> vector<8x128xf32>
    %c0_1 = arith.constant 0 : index
    %c0_2 = arith.constant 0 : index
    %2 = vector.load %arg1[%c0_1, %c0_2] : memref<8x128xf32, #tpu.memory_space<vmem>>, vector<8x128xf32>
    tpu.vector_store %arg1[%c0_1, %c0_2], %1 {strides = array<i32>} : memref<8x128xf32, #tpu.memory_space<vmem>>, vector<8x128xf32>,
    return
  }
}

</mosaic_0001>

<bundles_post_ra>
// kernel: tpu_custom_call.1
= control target key start
LH: loop header
LB: loop body
LE: loop exit
PB: predicated region body
PF: predicated region fallthrough
CT: control target
= control target key end

     0   :  { %6 = vsyncpa [#allocation3], 0  ;;  %s118_s0 = inlined_call_operand.hbm [shape: f32[8,128], index: 0, kind: input, shape index: {}]   ;;  %s119_s1 = inlined_call_operand.hbm [shape: f32[8,128], index: 1, kind: output, shape index: {}]  }
   0x1   :  { %7 = vsyncpa [#allocation4], 0  ;;  %s13_s8 = sshll.u32 %s118_s0, 4  ;;  %s99_s9 = smov [#allocation2]   ;;  %s14_s8 = int_to_ptr.hbm [resolvable:$true] %s13_s8 }
   0x2   :  { %s15_s10 = sshll.u32 %s99_s9, 4  ;;  %s16_s10 = int_to_ptr.vmem [resolvable:$true] %s15_s10 }
   0x3   :  { %18 = dma.hbm_to_vmem [thread:$0]  %s14_s8, 128, %s16_s10, [#allocation3]  }
   0x4   :  { %95 = dma.done.wait [#allocation3], 128  }
   0x5   :  { %96 = vsyncadd [#allocation3], 4294967168  ;;  %v23_v0 = vld [vmem:[#allocation2] sm:$0xff]  ;;  %s100_s11 = smov 1   ;;  %s101_s12 = smov [#allocation5]  }
   0x6   :  { %24 = vrot.lane.b32.xlu0 %v23_v0, %s100_s11  ;;  %s32_s13 = sshll.u32 %s101_s12, 4  ;;  %s34_s16 = sshll.u32 %s119_s1, 4  ;;  %s33_s13 = int_to_ptr.vmem [resolvable:$true] %s32_s13  ;;  %s35_s16 = int_to_ptr.hbm [resolvable:$true] %s34_s16 }
  0x78   :  { %v25_v1 = vpop.permute.xlu0 %24 }
  0x79   :  { %26 = vst [vmem:[#allocation5] sm:$0xff] %v25_v1 }
  0x7a   :  { %37 = dma.vmem_to_hbm [thread:$0]  %s33_s13, 128, %s35_s16, [#allocation4]  }
  0x7b   :  { %97 = dma.done.wait [#allocation4], 128  }
  0x7c   :  { %98 = vsyncadd [#allocation4], 4294967168 }
  0x7d   :  { %42 = vsyncpa [#allocation3], 1 }
  0x7e   :  { %43 = vsyncpa [#allocation4], 1 }

</bundles_post_ra>
